<compile_context>
chip_gen: v7x
topology: tpu7x:2x2x1
jax: 0.10.0
libtpu: 0.0.40
codegen_flags: <defaults>
</compile_context>

<pallas_src>
import functools

import jax
import jax.numpy as jnp
from jax.experimental import pallas as pl
from jax.experimental.pallas import tpu as pltpu


LN_EPS = 1e-5          # torch.nn.LayerNorm default
LEAKY_SLOPE = 0.01     # torch.nn.LeakyReLU default negative_slope
LANE = 128             # TPU lane width
SUBLANE = 8            # TPU sublane width
MAX_BATCH_TILE = 1024  # rows per grid step


def _round_up(x: int, m: int) -> int:
    return ((x + m - 1) // m) * m


def _number_encoder_kernel(x_ref, w1_ref, b1_ref, w2_ref, b2_ref, o_ref, *, d_in):
    """One (TB, DP) batch tile. Feature lanes >= d_in are zero padding."""
    x = x_ref[...]                                              # (TB, DP) f32

    # --- LayerNorm over the true d_in features (biased variance, like torch) ---
    inv_d = jnp.float32(1.0 / d_in)
    mean = jnp.sum(x, axis=-1, keepdims=True) * inv_d           # padded lanes are zero
    lane_id = jax.lax.broadcasted_iota(jnp.int32, x.shape, dimension=1)
    centered = jnp.where(lane_id < d_in, x - mean, 0.0)         # keep padded lanes at 0
    var = jnp.sum(centered * centered, axis=-1, keepdims=True) * inv_d
    xn = centered * jax.lax.rsqrt(var + LN_EPS)                 # gamma/beta folded into w1/b1

    # --- Linear(D -> E) with folded LN affine (MXU, f32 accumulate) ---
    h = jnp.dot(xn, w1_ref[...], preferred_element_type=jnp.float32) + b1_ref[...]

    # --- LeakyReLU (VPU) ---
    h = jnp.where(h > 0, h, LEAKY_SLOPE * h)

    # --- Linear(E -> E) ---
    o = jnp.dot(h, w2_ref[...], preferred_element_type=jnp.float32) + b2_ref[...]

    o_ref[...] = o.astype(o_ref.dtype)


def number_encoder_forward(x, gamma, beta, w1, b1, w2, b2, *, block_batch=MAX_BATCH_TILE):
    """x: (B, D_in) float32 -> (B, E) float32. Matches the PyTorch module's forward."""
    x = x.astype(jnp.float32)
    B, D = x.shape
    E = w1.shape[1]
    DP = _round_up(D, LANE)
    EP = _round_up(E, LANE)

    # Fold the LayerNorm affine into the first Linear (mathematically identical).
    w1f = w1.astype(jnp.float32)
    w1_eff = gamma.reshape(D, 1).astype(jnp.float32) * w1f                           # (D, E)
    b1_eff = beta.reshape(1, D).astype(jnp.float32) @ w1f \
        + b1.reshape(1, E).astype(jnp.float32)                                       # (1, E)

    # Lane-pad parameters to 128-wide so all kernel loads/stores are unmasked.
    w1p = jnp.zeros((DP, EP), jnp.float32).at[:D, :E].set(w1_eff)
    b1p = jnp.zeros((1, EP), jnp.float32).at[:, :E].set(b1_eff)
    w2p = jnp.zeros((EP, EP), jnp.float32).at[:E, :E].set(w2.astype(jnp.float32))
    b2p = jnp.zeros((1, EP), jnp.float32).at[:, :E].set(b2.reshape(1, E).astype(jnp.float32))

    # Batch tiling (zero-padded rows are sliced off at the end; they produce finite junk).
    TB = min(block_batch, _round_up(B, SUBLANE))
    Bp = _round_up(B, TB)
    xp = jnp.zeros((Bp, DP), jnp.float32).at[:B, :D].set(x)

    grid = (Bp // TB,)
    kernel = functools.partial(_number_encoder_kernel, d_in=D)

    cost = pl.CostEstimate(
        flops=2 * Bp * (DP * EP + EP * EP),
        transcendentals=0,
        bytes_accessed=4 * (Bp * DP + Bp * EP + DP * EP + EP * EP + 2 * EP),
    )

    out = pl.pallas_call(
        kernel,
        out_shape=jax.ShapeDtypeStruct((Bp, EP), jnp.float32),
        grid_spec=pltpu.PrefetchScalarGridSpec(
            num_scalar_prefetch=0,
            grid=grid,
            in_specs=[
                pl.BlockSpec((TB, DP), lambda i: (i, 0)),   # x tile, streamed over batch
                pl.BlockSpec((DP, EP), lambda i: (0, 0)),   # w1 (VMEM-resident)
                pl.BlockSpec((1, EP), lambda i: (0, 0)),    # b1
                pl.BlockSpec((EP, EP), lambda i: (0, 0)),   # w2
                pl.BlockSpec((1, EP), lambda i: (0, 0)),    # b2
            ],
            out_specs=pl.BlockSpec((TB, EP), lambda i: (i, 0)),
        ),
        compiler_params=pltpu.CompilerParams(
            dimension_semantics=("parallel",),
        ),
        cost_estimate=cost,
    )(xp, w1p, b1p, w2p, b2p)

    return out[:B, :E]


def init_params(key, numbers_np_dim, number_embedding_dim):
    """Deterministic synthetic parameters (shapes match the PyTorch module)."""
    k1, k2, k3, k4 = jax.random.split(key, 4)
    # LayerNorm: gamma=1, beta=0 (torch default init).
    gamma = jnp.ones((1, numbers_np_dim), jnp.float32)
    beta = jnp.zeros((1, numbers_np_dim), jnp.float32)
    # Linear layers: uniform(-1/sqrt(fan_in), 1/sqrt(fan_in)) like torch defaults.
    lim1 = 1.0 / jnp.sqrt(jnp.float32(numbers_np_dim))
    w1 = jax.random.uniform(k1, (numbers_np_dim, number_embedding_dim),
                            jnp.float32, -lim1, lim1)
    b1 = jax.random.uniform(k2, (1, number_embedding_dim), jnp.float32, -lim1, lim1)
    lim2 = 1.0 / jnp.sqrt(jnp.float32(number_embedding_dim))
    w2 = jax.random.uniform(k3, (number_embedding_dim, number_embedding_dim),
                            jnp.float32, -lim2, lim2)
    b2 = jax.random.uniform(k4, (1, number_embedding_dim), jnp.float32, -lim2, lim2)
    return gamma, beta, w1, b1, w2, b2


if __name__ == "__main__":
    numbers_np_dim = 16
    number_embedding_dim = 32
    batch = 8

    key = jax.random.PRNGKey(0)
    kx, kp = jax.random.split(key)

    # "numbers_np" input (the module casts to float32; we build it directly as f32).
    x = jax.random.normal(kx, (batch, numbers_np_dim), jnp.float32)
    gamma, beta, w1, b1, w2, b2 = init_params(kp, numbers_np_dim, number_embedding_dim)

    out = number_encoder_forward(x, gamma, beta, w1, b1, w2, b2)
    out = jax.block_until_ready(out)

    # Reference check in plain JAX (same math as the PyTorch module).
    mean = jnp.mean(x, axis=-1, keepdims=True)
    var = jnp.mean((x - mean) ** 2, axis=-1, keepdims=True)
    xn = (x - mean) / jnp.sqrt(var + LN_EPS) * gamma + beta
    h = xn @ w1 + b1
    h = jnp.where(h > 0, h, LEAKY_SLOPE * h)
    ref = h @ w2 + b2

    assert out.shape == (batch, number_embedding_dim)
    assert jnp.allclose(out, ref, atol=1e-4, rtol=1e-4), \
        f"max abs err = {jnp.max(jnp.abs(out - ref))}"

    print("KERNEL_OK")
</pallas_src>

<mosaic_0001>
module attributes {stable_mosaic.version = 11 : i64} {
  func.func @_number_encoder_kernel(%arg0: i32, %arg1: memref<8x128xf32, #tpu.memory_space<vmem>>, %arg2: memref<128x128xf32, #tpu.memory_space<vmem>>, %arg3: memref<1x128xf32, #tpu.memory_space<vmem>>, %arg4: memref<128x128xf32, #tpu.memory_space<vmem>>, %arg5: memref<1x128xf32, #tpu.memory_space<vmem>>, %arg6: memref<8x128xf32, #tpu.memory_space<vmem>>) attributes {dimension_semantics = [#tpu.dimension_semantics<parallel>], iteration_bounds = array<i64: 1>, scalar_prefetch = 0 : i64, scratch_operands = 0 : i64, tpu.core_type = #tpu.core_type<tc>, window_params = [{transform_indices = @transform_0, window_bounds = array<i64: 8, 128>}, {pipeline_mode = #tpu.pipeline_mode<synchronous>, transform_indices = @transform_1, window_bounds = array<i64: 128, 128>}, {pipeline_mode = #tpu.pipeline_mode<synchronous>, transform_indices = @transform_2, window_bounds = array<i64: 1, 128>}, {pipeline_mode = #tpu.pipeline_mode<synchronous>, transform_indices = @transform_3, window_bounds = array<i64: 128, 128>}, {pipeline_mode = #tpu.pipeline_mode<synchronous>, transform_indices = @transform_4, window_bounds = array<i64: 1, 128>}, {transform_indices = @transform_5, window_bounds = array<i64: 8, 128>}]} {
    %c0 = arith.constant 0 : index
    %c0_0 = arith.constant 0 : index
    %0 = vector.load %arg1[%c0, %c0_0] : memref<8x128xf32, #tpu.memory_space<vmem>>, vector<8x128xf32>
    %cst = arith.constant dense<0.000000e+00> : vector<8xf32>
    %1 = vector.multi_reduction <add>, %0, %cst [1] : vector<8x128xf32> to vector<8xf32>
    %2 = vector.shape_cast %1 : vector<8xf32> to vector<8x1xf32>
    %cst_1 = arith.constant 6.250000e-02 : f32
    %3 = vector.broadcast %cst_1 : f32 to vector<8x1xf32>
    %4 = arith.mulf %2, %3 : vector<8x1xf32>
    %5 = tpu.iota {dimensions = array<i32: 1>} : vector<8x128xi32>
    %c16_i32 = arith.constant 16 : i32
    %6 = vector.broadcast %c16_i32 : i32 to vector<8x128xi32>
    %7 = arith.cmpi slt, %5, %6 : vector<8x128xi32>
    %8 = vector.broadcast %4 : vector<8x1xf32> to vector<8x128xf32>
    %9 = arith.subf %0, %8 : vector<8x128xf32>
    %cst_2 = arith.constant 0.000000e+00 : f32
    %10 = vector.broadcast %cst_2 : f32 to vector<8x128xf32>
    %11 = arith.select %7, %9, %10 : vector<8x128xi1>, vector<8x128xf32>
    %12 = arith.mulf %11, %11 : vector<8x128xf32>
    %cst_3 = arith.constant dense<0.000000e+00> : vector<8xf32>
    %13 = vector.multi_reduction <add>, %12, %cst_3 [1] : vector<8x128xf32> to vector<8xf32>
    %14 = vector.shape_cast %13 : vector<8xf32> to vector<8x1xf32>
    %cst_4 = arith.constant 6.250000e-02 : f32
    %15 = vector.broadcast %cst_4 : f32 to vector<8x1xf32>
    %16 = arith.mulf %14, %15 : vector<8x1xf32>
    %cst_5 = arith.constant 9.99999974E-6 : f32
    %17 = vector.broadcast %cst_5 : f32 to vector<8x1xf32>
    %18 = arith.addf %16, %17 : vector<8x1xf32>
    %19 = math.rsqrt %18 : vector<8x1xf32>
    %20 = vector.broadcast %19 : vector<8x1xf32> to vector<8x128xf32>
    %21 = arith.mulf %11, %20 : vector<8x128xf32>
    %c0_6 = arith.constant 0 : index
    %c0_7 = arith.constant 0 : index
    %22 = vector.load %arg2[%c0_6, %c0_7] : memref<128x128xf32, #tpu.memory_space<vmem>>, vector<128x128xf32>
    %cst_8 = arith.constant dense<0.000000e+00> : vector<8x128xf32>
    %23 = tpu.matmul %21, %22, %cst_8 {dimension_numbers = #tpu.dot_dimension_numbers<[1], [0], [0], [1], [0, 0, 1, 1], [], []>} : vector<8x128xf32>, vector<128x128xf32>, vector<8x128xf32> -> vector<8x128xf32>
    %c0_9 = arith.constant 0 : index
    %c0_10 = arith.constant 0 : index
    %24 = vector.load %arg3[%c0_9, %c0_10] : memref<1x128xf32, #tpu.memory_space<vmem>>, vector<1x128xf32>
    %25 = vector.broadcast %24 : vector<1x128xf32> to vector<8x128xf32>
    %26 = arith.addf %23, %25 : vector<8x128xf32>
    %cst_11 = arith.constant 0.000000e+00 : f32
    %27 = vector.broadcast %cst_11 : f32 to vector<8x128xf32>
    %28 = arith.cmpf ogt, %26, %27 : vector<8x128xf32>
    %cst_12 = arith.constant 0.00999999977 : f32
    %29 = vector.broadcast %cst_12 : f32 to vector<8x128xf32>
    %30 = arith.mulf %29, %26 : vector<8x128xf32>
    %31 = arith.select %28, %26, %30 : vector<8x128xi1>, vector<8x128xf32>
    %c0_13 = arith.constant 0 : index
    %c0_14 = arith.constant 0 : index
    %32 = vector.load %arg4[%c0_13, %c0_14] : memref<128x128xf32, #tpu.memory_space<vmem>>, vector<128x128xf32>
    %cst_15 = arith.constant dense<0.000000e+00> : vector<8x128xf32>
    %33 = tpu.matmul %31, %32, %cst_15 {dimension_numbers = #tpu.dot_dimension_numbers<[1], [0], [0], [1], [0, 0, 1, 1], [], []>} : vector<8x128xf32>, vector<128x128xf32>, vector<8x128xf32> -> vector<8x128xf32>
    %c0_16 = arith.constant 0 : index
    %c0_17 = arith.constant 0 : index
    %34 = vector.load %arg5[%c0_16, %c0_17] : memref<1x128xf32, #tpu.memory_space<vmem>>, vector<1x128xf32>
    %35 = vector.broadcast %34 : vector<1x128xf32> to vector<8x128xf32>
    %36 = arith.addf %33, %35 : vector<8x128xf32>
    %c0_18 = arith.constant 0 : index
    %c0_19 = arith.constant 0 : index
    %37 = vector.load %arg6[%c0_18, %c0_19] : memref<8x128xf32, #tpu.memory_space<vmem>>, vector<8x128xf32>
    tpu.vector_store %arg6[%c0_18, %c0_19], %36 {strides = array<i32>} : memref<8x128xf32, #tpu.memory_space<vmem>>, vector<8x128xf32>,
    return
  }
  func.func @transform_0(%arg0: i32) -> (i32, i32) {
    %c0_i32 = arith.constant 0 : i32
    %c0_i32_0 = arith.constant 0 : i32
    return %arg0, %c0_i32 : i32, i32
  }
  func.func @transform_1(%arg0: i32) -> (i32, i32) {
    %c0_i32 = arith.constant 0 : i32
    %c0_i32_0 = arith.constant 0 : i32
    %c0_i32_1 = arith.constant 0 : i32
    return %c0_i32, %c0_i32_0 : i32, i32
  }
  func.func @transform_2(%arg0: i32) -> (i32, i32) {
    %c0_i32 = arith.constant 0 : i32
    %c0_i32_0 = arith.constant 0 : i32
    %c0_i32_1 = arith.constant 0 : i32
    return %c0_i32, %c0_i32_0 : i32, i32
  }
  func.func @transform_3(%arg0: i32) -> (i32, i32) {
    %c0_i32 = arith.constant 0 : i32
    %c0_i32_0 = arith.constant 0 : i32
    %c0_i32_1 = arith.constant 0 : i32
    return %c0_i32, %c0_i32_0 : i32, i32
  }
  func.func @transform_4(%arg0: i32) -> (i32, i32) {
    %c0_i32 = arith.constant 0 : i32
    %c0_i32_0 = arith.constant 0 : i32
    %c0_i32_1 = arith.constant 0 : i32
    return %c0_i32, %c0_i32_0 : i32, i32
  }
  func.func @transform_5(%arg0: i32) -> (i32, i32) {
    %c0_i32 = arith.constant 0 : i32
    %c0_i32_0 = arith.constant 0 : i32
    return %arg0, %c0_i32 : i32, i32
  }
}

</mosaic_0001>

<bundles_post_ra>
// kernel: tpu_custom_call.1
= control target key start
LH: loop header
LB: loop body
LE: loop exit
PB: predicated region body
PF: predicated region fallthrough
CT: control target
= control target key end

     0   :  { %10 = vsyncpa [#allocation3], 0  ;;  %s661_s0 = inlined_call_operand.hbm [shape: f32[8,128], index: 0, kind: input, shape index: {}]   ;;  %s662_s1 = inlined_call_operand.hbm [shape: f32[128,128], index: 1, kind: input, shape index: {}]   ;;  %s663_s2 = inlined_call_operand.vmem [shape: f32[1,128], index: 2, kind: input, shape index: {}]   ;;  %s664_s3 = inlined_call_operand.hbm [shape: f32[128,128], index: 3, kind: input, shape index: {}]   ;;  %s665_s4 = inlined_call_operand.vmem [shape: f32[1,128], index: 4, kind: input, shape index: {}]   ;;  %s666_s5 = inlined_call_operand.hbm [shape: f32[8,128], index: 5, kind: output, shape index: {}]  }
   0x1   :  { %11 = vsyncpa [#allocation6], 0 }
   0x2   :  { %12 = vsyncpa [#allocation4], 0  ;;  %s541_s18 = smov [#allocation5]   ;;  %s447_s22 = scalar_lea.hbm %s662_s1, 2048 }
   0x3   :  { %s28_s19 = sshll.u32 %s541_s18, 4  ;;  %p448_p0 = scmp.ne.s32.totalorder %s662_s1, %s447_s22  ;;  %s29_s19 = int_to_ptr.vmem [resolvable:$true] %s28_s19 }
   0x4   :  { %p451_p1 = scmp.lt.u32.totalorder %s447_s22, %s662_s1 }
   0x6   :  { %p453_p2 = pnand %p451_p1, %p448_p0 }
   0x8   :  { %456 = shalt.err (!%p453_p2)
}
   0x9   :  { %s457_s27 = scalar_lea.vmem %s29_s19, 2048  ;;  %p462_p4 = scmp.lt.s32.totalorder %s29_s19, %s29_s19 }
   0xa   :  { %p458_p3 = scmp.ne.s32.totalorder %s29_s19, %s457_s27  ;;  %p463_p5 = scmp.lt.s32.totalorder %s457_s27, %s457_s27 }
   0xc   :  { %p464_p6 = por %p463_p5, %p462_p4 }
   0xe   :  { %p465_p7 = pnand %p464_p6, %p458_p3 }
  0x10   :  { %468 = shalt.err (!%p465_p7)
}
  0x11   :  { %s542_s28 = smov 128   ;;  %s543_s29 = smov 8  }
  0x12   :  { %34 = dma.hbm_to_vmem [thread:$0]  %s662_s1, 2048, %s29_s19, [#allocation6], %s542_s28, %s542_s28, %s543_s29  }
  0x13   :  { %s544_s7 = smov [#allocation2]   ;;  %s545_s9 = smov [#allocation7]  }
  0x14   :  { %s19_s8 = sshll.u32 %s544_s7, 4  ;;  %s42_s10 = sshll.u32 %s545_s9, 4  ;;  %s20_s8 = int_to_ptr.vmem [resolvable:$true] %s19_s8  ;;  %s43_s10 = int_to_ptr.vmem [resolvable:$true] %s42_s10 }
  0x15   :  { %s469_s13 = scalar_lea.hbm %s661_s0, 128 }
  0x16   :  { %p470_p8 = scmp.ne.s32.totalorder %s661_s0, %s469_s13  ;;  %p473_p9 = scmp.lt.u32.totalorder %s469_s13, %s661_s0 }
  0x18   :  { %p475_p10 = pnand %p473_p9, %p470_p8 }
  0x1a   :  { %478 = shalt.err (!%p475_p10)
}
  0x1b   :  { %s479_s1 = scalar_lea.vmem %s20_s8, 128  ;;  %p484_p12 = scmp.lt.s32.totalorder %s20_s8, %s20_s8 }
  0x1c   :  { %p480_p11 = scmp.ne.s32.totalorder %s20_s8, %s479_s1  ;;  %p485_p13 = scmp.lt.s32.totalorder %s479_s1, %s479_s1 }
  0x1e   :  { %p486_p0 = por %p485_p13, %p484_p12 }
  0x20   :  { %p487_p1 = pnand %p486_p0, %p480_p11 }
  0x22   :  { %490 = shalt.err (!%p487_p1)
}
  0x23   :  { %22 = dma.hbm_to_vmem [thread:$0]  %s661_s0, 128, %s20_s8, [#allocation3]  }
  0x24   :  { %s491_s22 = scalar_lea.hbm %s664_s3, 2048 }
  0x25   :  { %p492_p2 = scmp.ne.s32.totalorder %s664_s3, %s491_s22  ;;  %p495_p3 = scmp.lt.u32.totalorder %s491_s22, %s664_s3 }
  0x27   :  { %p497_p4 = pnand %p495_p3, %p492_p2 }
  0x29   :  { %500 = shalt.err (!%p497_p4)
}
  0x2a   :  { %s501_s27 = scalar_lea.vmem %s43_s10, 2048  ;;  %p506_p6 = scmp.lt.s32.totalorder %s43_s10, %s43_s10 }
  0x2b   :  { %p502_p5 = scmp.ne.s32.totalorder %s43_s10, %s501_s27  ;;  %p507_p7 = scmp.lt.s32.totalorder %s501_s27, %s501_s27 }
  0x2d   :  { %p508_p8 = por %p507_p7, %p506_p6 }
  0x2f   :  { %p509_p9 = pnand %p508_p8, %p502_p5 }
  0x31   :  { %512 = shalt.err (!%p509_p9)
}
  0x32   :  { %48 = dma.hbm_to_vmem [thread:$0]  %s664_s3, 2048, %s43_s10, [#allocation6], %s542_s28, %s542_s28, %s543_s29  }
  0x33   :  { %535 = dma.done.wait [#allocation3], 128  }
  0x34   :  { %536 = vsyncadd [#allocation3], 4294967168 }
  0x35   :  { %537 = dma.done.wait [#allocation6], 4096  }
  0x36   :  { %538 = vsyncadd [#allocation6], 4294963200  ;;  %v60_v0 = vld [vmem:[#allocation2] sm:$0xff]  ;;  %v76_v1 = vld [vmem:[#allocation5] sm:$0xff]  ;;  %v546_v4 = vmov 0.0|0.0   ;;  %v64_v14 = vlaneseq  ;;  %vm547_vm1 = vmmov 0  }
  0x37   :  { %61 = vadd.xlane.f32.xlu0 %v60_v0  ;;  %v77_v2 = vld [vmem:[#allocation5 + $0x8] sm:$0xff]  ;;  %v78_v3 = vld [vmem:[#allocation5 + $0x10] sm:$0xff]  ;;  %388 = vmatprep.subr.bf16.mxu0 %v546_v4  ;;  %v79_v6 = vld [vmem:[#allocation5 + $0x18] sm:$0xff]  ;;  %v548_v29 = vmov 0.0   ;;  %s549_s7 = smov [#allocation8]  }
  0x38   :  { %v389_v5 = vpack.c.bf16 %v77_v2, %v76_v1  ;;  %412 = vmatprep.subr.bf16.mxu1 %v546_v4  ;;  %v392_v7 = vpack.c.bf16 %v79_v6, %v78_v3  ;;  %v80_v8 = vld [vmem:[#allocation5 + $0x20] sm:$0xff]  ;;  %v81_v9 = vld [vmem:[#allocation5 + $0x28] sm:$0xff]  ;;  %v82_v11 = vld [vmem:[#allocation5 + $0x30] sm:$0xff]  ;;  %v65_v15 = vand.u32 127, %v64_v14  ;;  %350 = vmatprep.mubr.msk.f32.mxu0 %vm547_vm1, %v548_v29  ;;  %s272_s8 = sshll.u32 %s549_s7, 4  ;;  %s273_s8 = int_to_ptr.vmem [resolvable:$true] %s272_s8 }
  0x39   :  { %v395_v10 = vpack.c.bf16 %v81_v9, %v80_v8  ;;  %v83_v12 = vld [vmem:[#allocation5 + $0x38] sm:$0xff]  ;;  %v84_v21 = vld [vmem:[#allocation5 + $0x40] sm:$0xff]  ;;  %v85_v22 = vld [vmem:[#allocation5 + $0x48] sm:$0xff]  ;;  %385 = vmatprep.mubr.msk.f32.mxu1 %vm547_vm1, %v548_v29  ;;  %s513_s9 = scalar_lea.vmem %s273_s8, 128  ;;  %p518_p11 = scmp.lt.s32.totalorder %s273_s8, %s273_s8 }
  0x3a   :  { %390 = vmatpush3.bf16.msra.mxu0 %v389_v5  ;;  %v398_v13 = vpack.c.bf16 %v83_v12, %v82_v11  ;;  %vm66_vm0 = vcmp.lt.s32.totalorder %v65_v15, 16  ;;  %v401_v23 = vpack.c.bf16 %v85_v22, %v84_v21  ;;  %v86_v24 = vld [vmem:[#allocation5 + $0x50] sm:$0xff]  ;;  %v87_v25 = vld [vmem:[#allocation5 + $0x58] sm:$0xff]  ;;  %v88_v27 = vld [vmem:[#allocation5 + $0x60] sm:$0xff]  ;;  %p514_p10 = scmp.ne.s32.totalorder %s273_s8, %s513_s9  ;;  %p519_p12 = scmp.lt.s32.totalorder %s513_s9, %s513_s9 }
  0x3b   :  { %391 = vmatprep.subr.bf16.mxu0 %v546_v4  ;;  %v404_v26 = vpack.c.bf16 %v87_v25, %v86_v24  ;;  %v89_v28 = vld [vmem:[#allocation5 + $0x68] sm:$0xff]  ;;  %v90_v31 = vld [vmem:[#allocation5 + $0x70] sm:$0xff]  ;;  %v91_v32 = vld [vmem:[#allocation5 + $0x78] sm:$0xff] }
  0x3c   :  { %v407_v30 = vpack.c.bf16 %v89_v28, %v88_v27  ;;  %v410_v33 = vpack.c.bf16 %v91_v32, %v90_v31  ;;  %v172_v34 = vld [vmem:[#allocation7] sm:$0xff]  ;;  %v173_v35 = vld [vmem:[#allocation7 + $0x8] sm:$0xff]  ;;  %v174_v36 = vld [vmem:[#allocation7 + $0x10] sm:$0xff]  ;;  %p520_p13 = por %p519_p12, %p518_p11 }
  0x3d   :  { %v413_v37 = vpack.c.bf16 %v173_v35, %v172_v34  ;;  %v175_v38 = vld [vmem:[#allocation7 + $0x18] sm:$0xff]  ;;  %v176_v40 = vld [vmem:[#allocation7 + $0x20] sm:$0xff]  ;;  %v177_v41 = vld [vmem:[#allocation7 + $0x28] sm:$0xff] }
  0x3e   :  { %393 = vmatpush3.bf16.msra.mxu0 %v392_v7  ;;  %v416_v39 = vpack.c.bf16 %v175_v38, %v174_v36  ;;  %v419_v42 = vpack.c.bf16 %v177_v41, %v176_v40  ;;  %v178_v43 = vld [vmem:[#allocation7 + $0x30] sm:$0xff]  ;;  %v179_v44 = vld [vmem:[#allocation7 + $0x38] sm:$0xff]  ;;  %v180_v46 = vld [vmem:[#allocation7 + $0x40] sm:$0xff]  ;;  %p521_p0 = pnand %p520_p13, %p514_p10 }
  0x3f   :  { %394 = vmatprep.subr.bf16.mxu0 %v546_v4  ;;  %414 = vmatpush3.bf16.msra.mxu1 %v413_v37  ;;  %v422_v45 = vpack.c.bf16 %v179_v44, %v178_v43  ;;  %v181_v47 = vld [vmem:[#allocation7 + $0x48] sm:$0xff]  ;;  %v182_v49 = vld [vmem:[#allocation7 + $0x50] sm:$0xff]  ;;  %v183_v50 = vld [vmem:[#allocation7 + $0x58] sm:$0xff] }
  0x40   :  { %415 = vmatprep.subr.bf16.mxu1 %v546_v4  ;;  %v425_v48 = vpack.c.bf16 %v181_v47, %v180_v46  ;;  %v428_v51 = vpack.c.bf16 %v183_v50, %v182_v49  ;;  %v184_v52 = vld [vmem:[#allocation7 + $0x60] sm:$0xff]  ;;  %v185_v53 = vld [vmem:[#allocation7 + $0x68] sm:$0xff]  ;;  %v186_v60 = vld [vmem:[#allocation7 + $0x70] sm:$0xff] }
  0x41   :  { %v431_v54 = vpack.c.bf16 %v185_v53, %v184_v52  ;;  %v187_v61 = vld [vmem:[#allocation7 + $0x78] sm:$0xff] }
  0x42   :  { %396 = vmatpush3.bf16.msra.mxu0 %v395_v10  ;;  %v434_v62 = vpack.c.bf16 %v187_v61, %v186_v60  ;;  %v282_v63 = vld [vmem:[%s663_s2] ss:$0 sm:$0xff] }
  0x43   :  { %397 = vmatprep.subr.bf16.mxu0 %v546_v4  ;;  %417 = vmatpush3.bf16.msra.mxu1 %v416_v39  ;;  %v283_v5 = vld [vmem:[%s665_s4] ss:$0 sm:$0xff] }
  0x44   :  { %418 = vmatprep.subr.bf16.mxu1 %v546_v4 }
  0x46   :  { %399 = vmatpush3.bf16.msra.mxu0 %v398_v13 }
  0x47   :  { %400 = vmatprep.subr.bf16.mxu0 %v546_v4  ;;  %420 = vmatpush3.bf16.msra.mxu1 %v419_v42 }
  0x48   :  { %421 = vmatprep.subr.bf16.mxu1 %v546_v4 }
  0x4a   :  { %402 = vmatpush3.bf16.msra.mxu0 %v401_v23 }
  0x4b   :  { %403 = vmatprep.subr.bf16.mxu0 %v546_v4  ;;  %423 = vmatpush3.bf16.msra.mxu1 %v422_v45 }
  0x4c   :  { %424 = vmatprep.subr.bf16.mxu1 %v546_v4 }
  0x4e   :  { %405 = vmatpush3.bf16.msra.mxu0 %v404_v26 }
  0x4f   :  { %406 = vmatprep.subr.bf16.mxu0 %v546_v4  ;;  %426 = vmatpush3.bf16.msra.mxu1 %v425_v48 }
  0x50   :  { %427 = vmatprep.subr.bf16.mxu1 %v546_v4 }
  0x52   :  { %408 = vmatpush3.bf16.msra.mxu0 %v407_v30 }
  0x53   :  { %409 = vmatprep.subr.bf16.mxu0 %v546_v4  ;;  %429 = vmatpush3.bf16.msra.mxu1 %v428_v51 }
  0x54   :  { %430 = vmatprep.subr.bf16.mxu1 %v546_v4 }
  0x56   :  { %411 = vmatpush3.bf16.msra.mxu0 %v410_v33 }
  0x57   :  { %432 = vmatpush3.bf16.msra.mxu1 %v431_v54 }
  0x58   :  { %433 = vmatprep.subr.bf16.mxu1 %v546_v4 }
  0x5b   :  { %435 = vmatpush3.bf16.msra.mxu1 %v434_v62 }
  0xc4   :  { %v62_v16 = vpop.xlane.xlu0 %61 }
  0xc5   :  { %v63_v17 = vmul.f32 0.0625, %v62_v16 }
  0xc7   :  { %v67_v18 = vsub.f32 %v60_v0, %v63_v17 }
  0xc9   :  { %v628_v19 = vsel %vm66_vm0, %v67_v18, 0.0 }
  0xca   :  { %v69_v20 = vmul.f32 %v628_v19, %v628_v19 }
  0xcc   :  { %70 = vadd.xlane.f32.xlu0 %v69_v20 }
 0x159   :  { %v71_v55 = vpop.xlane.xlu0 %70 }
 0x15a   :  { %v72_v56 = vmul.f32 0.0625, %v71_v55 }
 0x15c   :  { %v73_v57 = vadd.f32 1e-05, %v72_v56 }
 0x15e   :  { %445 = vrsqrt.f32 %v73_v57 }
 0x168   :  { %v446_v58 = vpop.eup %445 }
 0x169   :  { %v75_v59 = vmul.f32 %v446_v58, %v628_v19 }
 0x16b   :  { %351 = vmatmul.mubr.f32.vlgmr.msra.gmra.mrb[0].mxu0 %v75_v59 }
 0x23e   :  { %v165_v0 = vpop.f32.mrb[0].mxu0 }
 0x23f   :  { %v166_v1 = vadd.f32 %v282_v63, %v165_v0  ;;  %v352_v2 = vpop.f32.mrb[1].mxu0 }
 0x241   :  { %v170_v3 = vmul.f32 0.01, %v166_v1  ;;  %vm169_vm2 = vcmp.gt.f32.partialorder %v166_v1, 0.0 }
 0x243   :  { %v171_v4 = vsel %vm169_vm2, %v166_v1, %v170_v3 }
 0x244   :  { %386 = vmatmul.mubr.f32.vlgmr.msra.gmra.mrb[0].mxu1 %v171_v4 }
 0x317   :  { %v261_v6 = vpop.f32.mrb[0].mxu1 }
 0x318   :  { %v262_v7 = vadd.f32 %v283_v5, %v261_v6  ;;  %v387_v8 = vpop.f32.mrb[1].mxu1 }
 0x31a   :  { %265 = vst [vmem:[#allocation8] sm:$0xff] %v262_v7 }
 0x31b   :  { %524 = shalt.err (!%p521_p0)
}
 0x31c   :  { %s525_s11 = scalar_lea.hbm %s666_s5, 128 }
 0x31d   :  { %p526_p1 = scmp.ne.s32.totalorder %s666_s5, %s525_s11  ;;  %p529_p2 = scmp.lt.u32.totalorder %s525_s11, %s666_s5 }
 0x31f   :  { %p531_p3 = pnand %p529_p2, %p526_p1 }
 0x321   :  { %534 = shalt.err (!%p531_p3)
}
 0x322   :  { %275 = dma.vmem_to_hbm [thread:$0]  %s273_s8, 128, %s666_s5, [#allocation4]  }
 0x323   :  { %539 = dma.done.wait [#allocation4], 128  }
 0x324   :  { %540 = vsyncadd [#allocation4], 4294967168 }
 0x325   :  { %279 = vsyncpa [#allocation3], 1 }
 0x326   :  { %280 = vsyncpa [#allocation6], 1 }
 0x327   :  { %281 = vsyncpa [#allocation4], 1 }

</bundles_post_ra>
